<compile_context>
chip_gen: v5e
topology: v5e:2x2
jax: 0.10.0
libtpu: 0.0.40
codegen_flags: <defaults>
</compile_context>

<pallas_src>
import functools

import jax
import jax.numpy as jnp
from jax.experimental import pallas as pl
from jax.experimental.pallas import tpu as pltpu

LN_EPS = 1e-5          # PyTorch LayerNorm default


def _rup(n, m):
    return -(-n // m) * m


def _v_row_offsets(num_layers):
    """Section order inside the f32 bias/LN-param slab (one section = B rows)."""
    off, r = {}, 0

    def add(name):
        nonlocal r
        off[name] = r
        r += 1

    add("fc1_b")
    for l in range(num_layers):
        add(f"b_attn{l}")
        add(f"ln1_g{l}")
        add(f"ln1_b{l}")
        add(f"b1_{l}")
        add(f"b2_{l}")
        if l < num_layers - 1:          # last layer's ln2 affine is folded into the head
            add(f"ln2_g{l}")
            add(f"ln2_b{l}")
    add("head_b")
    return off, r


# --------------------------------- kernel ---------------------------------

def classifier_kernel(x_ref, wn_ref, ww_ref, v_ref, out_ref, *, num_layers, ff_dim):
    bf16 = jnp.bfloat16
    B, d_in = x_ref.shape
    H = wn_ref.shape[1]
    FF = ff_dim
    out_pad = out_ref.shape[1]
    L = num_layers

    # Static, tile-aligned section offsets into the packed slabs.
    d_pad = _rup(d_in, 16)              # bf16 sublane tile = 16 rows
    wn_attn = d_pad
    wn_w2 = d_pad + L * H
    ww_head = L * H

    voff, _ = _v_row_offsets(L)

    def vec(name, width=H):
        # Bias / LN param pre-broadcast to B sublanes offline -> one aligned vload.
        r = voff[name] * B              # B % 8 == 0  =>  f32 tile-aligned start
        return v_ref[r:r + B, 0:width]

    def layernorm(x, gamma=None, beta=None):
        # One-pass biased variance (independent reductions; clamp for cancellation).
        mean = jnp.mean(x, axis=-1, keepdims=True)
        mean_sq = jnp.mean(x * x, axis=-1, keepdims=True)
        var = jnp.maximum(mean_sq - mean * mean, 0.0)
        y = (x - mean) * jax.lax.rsqrt(var + LN_EPS)
        if gamma is not None:
            y = y * gamma + beta
        return y

    # fc1 + relu  (bf16 MXU operands, f32 accumulate).
    h = jnp.maximum(
        jnp.dot(x_ref[...].astype(bf16), wn_ref[0:d_in, :],
                preferred_element_type=jnp.float32) + vec("fc1_b"),
        0.0)

    # TransformerEncoder (post-norm, relu FF, eval mode => dropout = identity).
    # seq_len == 1  =>  attention == out_proj(value_proj(h)), pre-folded into W_attn.
    for l in range(L):                   # static unroll: 4 layers of tiny weights
        w_attn = wn_ref[wn_attn + l * H:wn_attn + (l + 1) * H, :]
        attn = (jnp.dot(h.astype(bf16), w_attn, preferred_element_type=jnp.float32)
                + vec(f"b_attn{l}"))
        h = layernorm(h + attn, vec(f"ln1_g{l}"), vec(f"ln1_b{l}"))

        w1 = ww_ref[l * H:(l + 1) * H, 0:FF]
        ff = jnp.maximum(
            jnp.dot(h.astype(bf16), w1, preferred_element_type=jnp.float32)
            + vec(f"b1_{l}", FF), 0.0)
        w2 = wn_ref[wn_w2 + l * FF:wn_w2 + (l + 1) * FF, :]
        ff = (jnp.dot(ff.astype(bf16), w2, preferred_element_type=jnp.float32)
              + vec(f"b2_{l}"))

        if l < L - 1:
            h = layernorm(h + ff, vec(f"ln2_g{l}"), vec(f"ln2_b{l}"))
        else:
            h = layernorm(h + ff)        # affine folded into the fused head offline

    # self.dropout: identity in eval mode.  Fused emo+sent head, lane-dense store.
    head_w = ww_ref[ww_head:ww_head + H, 0:out_pad]
    out_ref[...] = (jnp.dot(h.astype(bf16), head_w, preferred_element_type=jnp.float32)
                    + vec("head_b", out_pad))


# --------------------------------- wrapper --------------------------------

def classifier_forward(x, packed, *, num_emo, num_emo_classes, num_sent_classes):
    d = packed["dims"]
    B = x.shape[0]
    assert packed["vecs"].shape[0] == d["v_rows"] * B, \
        "bias slab was packed for a different batch size"
    kernel = functools.partial(classifier_kernel,
                               num_layers=d["num_layers"], ff_dim=d["ff"])
    out = pl.pallas_call(
        kernel,
        out_shape=jax.ShapeDtypeStruct((B, d["out_pad"]), jnp.float32),
        in_specs=[pl.BlockSpec(memory_space=pltpu.MemorySpace.VMEM)] * 4,
        out_specs=pl.BlockSpec(memory_space=pltpu.MemorySpace.VMEM),
    )(x, packed["wn"], packed["ww"], packed["vecs"])
    # glue: split fused head + view(-1, num_emo, num_emo_classes)
    n_emo = num_emo * num_emo_classes
    emo = out[:, :n_emo].reshape(B, num_emo, num_emo_classes)
    sent = out[:, n_emo:n_emo + num_sent_classes]
    return emo, sent


# ------------------------- parameter construction -------------------------

def init_params(key, *, input_dim, hidden_dim, ff_dim, num_layers,
                num_emo, num_emo_classes, num_sent_classes):
    """Deterministic synthetic parameters (shapes follow Classifier.__init__),
    stored per-module exactly like the PyTorch layout (conceptually transposed)."""
    def w(k, shape, scale=0.05):
        return (scale * jax.random.normal(k, shape)).astype(jnp.float32)

    keys = jax.random.split(key, 16)
    H, FF, L = hidden_dim, ff_dim, num_layers
    return dict(
        fc1_w=w(keys[0], (input_dim, H)),
        fc1_b=w(keys[1], (H,)),
        wv=w(keys[2], (L, H, H)),          # value-projection slice of in_proj_weight
        bv=w(keys[3], (L, H)),
        wo=w(keys[4], (L, H, H)),          # attention out_proj
        bo=w(keys[5], (L, H)),
        ln1_g=jnp.ones((L, H), jnp.float32),
        ln1_b=jnp.zeros((L, H), jnp.float32),
        w1=w(keys[6], (L, H, FF)),         # linear1 (d_model -> dim_feedforward)
        b1=w(keys[7], (L, FF)),
        w2=w(keys[8], (L, FF, H)),         # linear2 (dim_feedforward -> d_model)
        b2=w(keys[9], (L, H)),
        ln2_g=jnp.ones((L, H), jnp.float32),
        ln2_b=jnp.zeros((L, H), jnp.float32),
        emo_w=w(keys[10], (H, num_emo * num_emo_classes)),
        emo_b=w(keys[11], (num_emo * num_emo_classes,)),
        sent_w=w(keys[12], (H, num_sent_classes)),
        sent_b=w(keys[13], (num_sent_classes,)),
    )


def pack_params(raw, *, batch):
    """One-time offline fusion / slab packing of the raw params for the kernel."""
    f32, bf16 = jnp.float32, jnp.bfloat16
    L, H, _ = raw["wv"].shape
    D_in = raw["fc1_w"].shape[0]
    FF = raw["w1"].shape[2]
    assert batch % 8 == 0, "bias slab is pre-broadcast to the batch (8-row f32 tiles)"
    assert H % 16 == 0 and FF % 16 == 0, "bf16 slab sections must be 16-row aligned"

    # Fold seq_len==1 attention:  attn(x) = x @ (Wv @ Wo) + (bv @ Wo + bo)
    w_attn = jnp.einsum("lij,ljk->lik", raw["wv"], raw["wo"])
    b_attn = jnp.einsum("lj,ljk->lk", raw["bv"], raw["wo"]) + raw["bo"]

    # Fused emo+sent head with the LAST layer's ln2 affine folded in:
    #   ln2(x) @ Wh + bh == norm(x) @ (diag(g) Wh) + (b @ Wh + bh)
    head_w = jnp.concatenate([raw["emo_w"], raw["sent_w"]], axis=1)   # (H, n_out)
    head_b = jnp.concatenate([raw["emo_b"], raw["sent_b"]], axis=0)   # (n_out,)
    head_b = raw["ln2_b"][L - 1] @ head_w + head_b
    head_w = raw["ln2_g"][L - 1][:, None] * head_w
    n_out = head_w.shape[1]
    out_pad = _rup(max(n_out, 128), 128)
    wide = max(FF, out_pad)

    # Narrow bf16 weight slab (H lanes): [fc1_w | W_attn (L*H rows) | W2 (L*FF rows)]
    d_pad = _rup(D_in, 16)
    wn = jnp.zeros((d_pad + L * H + L * FF, H), f32)
    wn = wn.at[:D_in].set(raw["fc1_w"])
    wn = wn.at[d_pad:d_pad + L * H].set(w_attn.reshape(L * H, H))
    wn = wn.at[d_pad + L * H:].set(raw["w2"].reshape(L * FF, H))
    # TODO(synk): storing W2 lane-dense as (H, FF) + dot_general(trans_b) was skipped;
    # it may lower with an extra XLU transpose, so the (FF, H) layout is kept.

    # Wide bf16 weight slab (`wide` lanes): [W1 (L*H rows) | fused head (H rows)]
    ww = jnp.zeros((L * H + H, wide), f32)
    ww = ww.at[:L * H, :FF].set(raw["w1"].reshape(L * H, FF))
    ww = ww.at[L * H:, :n_out].set(head_w)

    # f32 bias / LN-param slab; every vector pre-broadcast to `batch` sublanes so each
    # in-kernel use is one aligned (batch, width) vload (no sublane rotate / broadcast).
    voff, n_rows = _v_row_offsets(L)
    v = jnp.zeros((n_rows * batch, wide), f32)

    def put(slab, name, vecv):
        r = voff[name] * batch
        return slab.at[r:r + batch, :vecv.shape[0]].set(
            jnp.broadcast_to(vecv, (batch, vecv.shape[0])))

    v = put(v, "fc1_b", raw["fc1_b"])
    for l in range(L):
        v = put(v, f"b_attn{l}", b_attn[l])
        v = put(v, f"ln1_g{l}", raw["ln1_g"][l])
        v = put(v, f"ln1_b{l}", raw["ln1_b"][l])
        v = put(v, f"b1_{l}", raw["b1"][l])
        v = put(v, f"b2_{l}", raw["b2"][l])
        if l < L - 1:
            v = put(v, f"ln2_g{l}", raw["ln2_g"][l])
            v = put(v, f"ln2_b{l}", raw["ln2_b"][l])
    v = put(v, "head_b", head_b)

    return dict(
        wn=wn.astype(bf16), ww=ww.astype(bf16), vecs=v,
        dims=dict(num_layers=L, ff=FF, out_pad=out_pad, v_rows=n_rows))


# --------------------------- pure-JAX reference ---------------------------

def _ln_ref(x, g, b):
    mean = jnp.mean(x, axis=-1, keepdims=True)
    var = jnp.mean((x - mean) ** 2, axis=-1, keepdims=True)
    return (x - mean) * jax.lax.rsqrt(var + LN_EPS) * g + b


def reference_forward(x, raw, *, num_emo, num_emo_classes):
    """Unfused f32 reference following the PyTorch module step-by-step (eval mode)."""
    h = jax.nn.relu(x @ raw["fc1_w"] + raw["fc1_b"])
    for l in range(raw["wv"].shape[0]):
        v = h @ raw["wv"][l] + raw["bv"][l]
        attn = v @ raw["wo"][l] + raw["bo"][l]
        h = _ln_ref(h + attn, raw["ln1_g"][l], raw["ln1_b"][l])
        ff = jax.nn.relu(h @ raw["w1"][l] + raw["b1"][l])
        ff = ff @ raw["w2"][l] + raw["b2"][l]
        h = _ln_ref(h + ff, raw["ln2_g"][l], raw["ln2_b"][l])
    emo = (h @ raw["emo_w"] + raw["emo_b"]).reshape(-1, num_emo, num_emo_classes)
    sent = h @ raw["sent_w"] + raw["sent_b"]
    return emo, sent


if __name__ == "__main__":
    # Small shapes consistent with the module's forward: batch=8, input_dim=16,
    # hidden_dim=32 (nheads divides it; seq_len==1 collapses attention so head
    # count does not affect the math), dim_feedforward = 4 * hidden, 4 layers.
    B, INPUT_DIM, HIDDEN, LAYERS = 8, 16, 32, 4
    NUM_EMO, NUM_EMO_CLASSES, NUM_SENT_CLASSES = 6, 4, 5

    key = jax.random.PRNGKey(0)
    k_x, k_p = jax.random.split(key)
    x = jax.random.normal(k_x, (B, INPUT_DIM), dtype=jnp.float32)
    raw = init_params(k_p, input_dim=INPUT_DIM, hidden_dim=HIDDEN,
                      ff_dim=4 * HIDDEN, num_layers=LAYERS, num_emo=NUM_EMO,
                      num_emo_classes=NUM_EMO_CLASSES,
                      num_sent_classes=NUM_SENT_CLASSES)
    packed = pack_params(raw, batch=B)

    fwd = functools.partial(classifier_forward, num_emo=NUM_EMO,
                            num_emo_classes=NUM_EMO_CLASSES,
                            num_sent_classes=NUM_SENT_CLASSES)
    emo_out, sent_out = jax.jit(lambda a: fwd(a, packed))(x)
    jax.block_until_ready((emo_out, sent_out))

    assert emo_out.shape == (B, NUM_EMO, NUM_EMO_CLASSES), emo_out.shape
    assert sent_out.shape == (B, NUM_SENT_CLASSES), sent_out.shape

    # Correctness check vs. the unfused f32 reference.  Tolerance accounts for the
    # bf16 MXU operands in the 14-deep serial matmul chain (expected error ~3e-3).
    emo_ref, sent_ref = reference_forward(x, raw, num_emo=NUM_EMO,
                                          num_emo_classes=NUM_EMO_CLASSES)
    assert jnp.allclose(emo_out, emo_ref, rtol=2e-2, atol=2e-2), \
        float(jnp.max(jnp.abs(emo_out - emo_ref)))
    assert jnp.allclose(sent_out, sent_ref, rtol=2e-2, atol=2e-2), \
        float(jnp.max(jnp.abs(sent_out - sent_ref)))

    print("KERNEL_OK")
</pallas_src>

<mosaic_0001>
module attributes {stable_mosaic.version = 11 : i64} {
  func.func @classifier_kernel(%arg0: memref<8x16xf32, #tpu.memory_space<vmem>>, %arg1: memref<656x32xbf16, #tpu.memory_space<vmem>>, %arg2: memref<160x128xbf16, #tpu.memory_space<vmem>>, %arg3: memref<224x128xf32, #tpu.memory_space<vmem>>, %arg4: memref<8x128xf32, #tpu.memory_space<vmem>>) attributes {dimension_semantics = [], scalar_prefetch = 0 : i64, scratch_operands = 0 : i64, tpu.core_type = #tpu.core_type<tc>} {
    %c0 = arith.constant 0 : index
    %c0_0 = arith.constant 0 : index
    %0 = vector.load %arg0[%c0, %c0_0] : memref<8x16xf32, #tpu.memory_space<vmem>>, vector<8x16xf32>
    %1 = arith.truncf %0 : vector<8x16xf32> to vector<8x16xbf16>
    %c0_1 = arith.constant 0 : index
    %c0_2 = arith.constant 0 : index
    %2 = vector.load %arg1[%c0_1, %c0_2] : memref<656x32xbf16, #tpu.memory_space<vmem>>, vector<16x32xbf16>
    %cst = arith.constant dense<0.000000e+00> : vector<8x32xf32>
    %3 = tpu.matmul %1, %2, %cst {dimension_numbers = #tpu.dot_dimension_numbers<[1], [0], [0], [1], [0, 0, 1, 1], [], []>} : vector<8x16xbf16>, vector<16x32xbf16>, vector<8x32xf32> -> vector<8x32xf32>
    %c0_3 = arith.constant 0 : index
    %c0_4 = arith.constant 0 : index
    %4 = vector.load %arg3[%c0_3, %c0_4] : memref<224x128xf32, #tpu.memory_space<vmem>>, vector<8x32xf32>
    %5 = arith.addf %3, %4 : vector<8x32xf32>
    %cst_5 = arith.constant 0.000000e+00 : f32
    %6 = vector.broadcast %cst_5 : f32 to vector<8x32xf32>
    %7 = arith.maximumf %5, %6 : vector<8x32xf32>
    %c16 = arith.constant 16 : index
    %c0_6 = arith.constant 0 : index
    %8 = vector.load %arg1[%c16, %c0_6] : memref<656x32xbf16, #tpu.memory_space<vmem>>, vector<32x32xbf16>
    %9 = arith.truncf %7 : vector<8x32xf32> to vector<8x32xbf16>
    %cst_7 = arith.constant dense<0.000000e+00> : vector<8x32xf32>
    %10 = tpu.matmul %9, %8, %cst_7 {dimension_numbers = #tpu.dot_dimension_numbers<[1], [0], [0], [1], [0, 0, 1, 1], [], []>} : vector<8x32xbf16>, vector<32x32xbf16>, vector<8x32xf32> -> vector<8x32xf32>
    %c8 = arith.constant 8 : index
    %c0_8 = arith.constant 0 : index
    %11 = vector.load %arg3[%c8, %c0_8] : memref<224x128xf32, #tpu.memory_space<vmem>>, vector<8x32xf32>
    %12 = arith.addf %10, %11 : vector<8x32xf32>
    %13 = arith.addf %7, %12 : vector<8x32xf32>
    %c16_9 = arith.constant 16 : index
    %c0_10 = arith.constant 0 : index
    %14 = vector.load %arg3[%c16_9, %c0_10] : memref<224x128xf32, #tpu.memory_space<vmem>>, vector<8x32xf32>
    %c24 = arith.constant 24 : index
    %c0_11 = arith.constant 0 : index
    %15 = vector.load %arg3[%c24, %c0_11] : memref<224x128xf32, #tpu.memory_space<vmem>>, vector<8x32xf32>
    %cst_12 = arith.constant dense<0.000000e+00> : vector<8xf32>
    %16 = vector.multi_reduction <add>, %13, %cst_12 [1] : vector<8x32xf32> to vector<8xf32>
    %17 = vector.shape_cast %16 : vector<8xf32> to vector<8x1xf32>
    %cst_13 = arith.constant 3.200000e+01 : f32
    %18 = vector.broadcast %cst_13 : f32 to vector<8x1xf32>
    %19 = arith.divf %17, %18 : vector<8x1xf32>
    %20 = arith.mulf %13, %13 : vector<8x32xf32>
    %cst_14 = arith.constant dense<0.000000e+00> : vector<8xf32>
    %21 = vector.multi_reduction <add>, %20, %cst_14 [1] : vector<8x32xf32> to vector<8xf32>
    %22 = vector.shape_cast %21 : vector<8xf32> to vector<8x1xf32>
    %cst_15 = arith.constant 3.200000e+01 : f32
    %23 = vector.broadcast %cst_15 : f32 to vector<8x1xf32>
    %24 = arith.divf %22, %23 : vector<8x1xf32>
    %25 = arith.mulf %19, %19 : vector<8x1xf32>
    %26 = arith.subf %24, %25 : vector<8x1xf32>
    %cst_16 = arith.constant 0.000000e+00 : f32
    %27 = vector.broadcast %cst_16 : f32 to vector<8x1xf32>
    %28 = arith.maximumf %26, %27 : vector<8x1xf32>
    %29 = vector.broadcast %19 : vector<8x1xf32> to vector<8x32xf32>
    %30 = arith.subf %13, %29 : vector<8x32xf32>
    %cst_17 = arith.constant 9.99999974E-6 : f32
    %31 = vector.broadcast %cst_17 : f32 to vector<8x1xf32>
    %32 = arith.addf %28, %31 : vector<8x1xf32>
    %33 = math.rsqrt %32 : vector<8x1xf32>
    %34 = vector.broadcast %33 : vector<8x1xf32> to vector<8x32xf32>
    %35 = arith.mulf %30, %34 : vector<8x32xf32>
    %36 = arith.mulf %35, %14 : vector<8x32xf32>
    %37 = arith.addf %36, %15 : vector<8x32xf32>
    %c0_18 = arith.constant 0 : index
    %c0_19 = arith.constant 0 : index
    %38 = vector.load %arg2[%c0_18, %c0_19] : memref<160x128xbf16, #tpu.memory_space<vmem>>, vector<32x128xbf16>
    %39 = arith.truncf %37 : vector<8x32xf32> to vector<8x32xbf16>
    %cst_20 = arith.constant dense<0.000000e+00> : vector<8x128xf32>
    %40 = tpu.matmul %39, %38, %cst_20 {dimension_numbers = #tpu.dot_dimension_numbers<[1], [0], [0], [1], [0, 0, 1, 1], [], []>} : vector<8x32xbf16>, vector<32x128xbf16>, vector<8x128xf32> -> vector<8x128xf32>
    %c32 = arith.constant 32 : index
    %c0_21 = arith.constant 0 : index
    %41 = vector.load %arg3[%c32, %c0_21] : memref<224x128xf32, #tpu.memory_space<vmem>>, vector<8x128xf32>
    %42 = arith.addf %40, %41 : vector<8x128xf32>
    %cst_22 = arith.constant 0.000000e+00 : f32
    %43 = vector.broadcast %cst_22 : f32 to vector<8x128xf32>
    %44 = arith.maximumf %42, %43 : vector<8x128xf32>
    %c144 = arith.constant 144 : index
    %c0_23 = arith.constant 0 : index
    %45 = vector.load %arg1[%c144, %c0_23] : memref<656x32xbf16, #tpu.memory_space<vmem>>, vector<128x32xbf16>
    %46 = arith.truncf %44 : vector<8x128xf32> to vector<8x128xbf16>
    %cst_24 = arith.constant dense<0.000000e+00> : vector<8x32xf32>
    %47 = tpu.matmul %46, %45, %cst_24 {dimension_numbers = #tpu.dot_dimension_numbers<[1], [0], [0], [1], [0, 0, 1, 1], [], []>} : vector<8x128xbf16>, vector<128x32xbf16>, vector<8x32xf32> -> vector<8x32xf32>
    %c40 = arith.constant 40 : index
    %c0_25 = arith.constant 0 : index
    %48 = vector.load %arg3[%c40, %c0_25] : memref<224x128xf32, #tpu.memory_space<vmem>>, vector<8x32xf32>
    %49 = arith.addf %47, %48 : vector<8x32xf32>
    %50 = arith.addf %37, %49 : vector<8x32xf32>
    %c48 = arith.constant 48 : index
    %c0_26 = arith.constant 0 : index
    %51 = vector.load %arg3[%c48, %c0_26] : memref<224x128xf32, #tpu.memory_space<vmem>>, vector<8x32xf32>
    %c56 = arith.constant 56 : index
    %c0_27 = arith.constant 0 : index
    %52 = vector.load %arg3[%c56, %c0_27] : memref<224x128xf32, #tpu.memory_space<vmem>>, vector<8x32xf32>
    %cst_28 = arith.constant dense<0.000000e+00> : vector<8xf32>
    %53 = vector.multi_reduction <add>, %50, %cst_28 [1] : vector<8x32xf32> to vector<8xf32>
    %54 = vector.shape_cast %53 : vector<8xf32> to vector<8x1xf32>
    %cst_29 = arith.constant 3.200000e+01 : f32
    %55 = vector.broadcast %cst_29 : f32 to vector<8x1xf32>
    %56 = arith.divf %54, %55 : vector<8x1xf32>
    %57 = arith.mulf %50, %50 : vector<8x32xf32>
    %cst_30 = arith.constant dense<0.000000e+00> : vector<8xf32>
    %58 = vector.multi_reduction <add>, %57, %cst_30 [1] : vector<8x32xf32> to vector<8xf32>
    %59 = vector.shape_cast %58 : vector<8xf32> to vector<8x1xf32>
    %cst_31 = arith.constant 3.200000e+01 : f32
    %60 = vector.broadcast %cst_31 : f32 to vector<8x1xf32>
    %61 = arith.divf %59, %60 : vector<8x1xf32>
    %62 = arith.mulf %56, %56 : vector<8x1xf32>
    %63 = arith.subf %61, %62 : vector<8x1xf32>
    %cst_32 = arith.constant 0.000000e+00 : f32
    %64 = vector.broadcast %cst_32 : f32 to vector<8x1xf32>
    %65 = arith.maximumf %63, %64 : vector<8x1xf32>
    %66 = vector.broadcast %56 : vector<8x1xf32> to vector<8x32xf32>
    %67 = arith.subf %50, %66 : vector<8x32xf32>
    %cst_33 = arith.constant 9.99999974E-6 : f32
    %68 = vector.broadcast %cst_33 : f32 to vector<8x1xf32>
    %69 = arith.addf %65, %68 : vector<8x1xf32>
    %70 = math.rsqrt %69 : vector<8x1xf32>
    %71 = vector.broadcast %70 : vector<8x1xf32> to vector<8x32xf32>
    %72 = arith.mulf %67, %71 : vector<8x32xf32>
    %73 = arith.mulf %72, %51 : vector<8x32xf32>
    %74 = arith.addf %73, %52 : vector<8x32xf32>
    %c48_34 = arith.constant 48 : index
    %c0_35 = arith.constant 0 : index
    %75 = vector.load %arg1[%c48_34, %c0_35] : memref<656x32xbf16, #tpu.memory_space<vmem>>, vector<32x32xbf16>
    %76 = arith.truncf %74 : vector<8x32xf32> to vector<8x32xbf16>
    %cst_36 = arith.constant dense<0.000000e+00> : vector<8x32xf32>
    %77 = tpu.matmul %76, %75, %cst_36 {dimension_numbers = #tpu.dot_dimension_numbers<[1], [0], [0], [1], [0, 0, 1, 1], [], []>} : vector<8x32xbf16>, vector<32x32xbf16>, vector<8x32xf32> -> vector<8x32xf32>
    %c64 = arith.constant 64 : index
    %c0_37 = arith.constant 0 : index
    %78 = vector.load %arg3[%c64, %c0_37] : memref<224x128xf32, #tpu.memory_space<vmem>>, vector<8x32xf32>
    %79 = arith.addf %77, %78 : vector<8x32xf32>
    %80 = arith.addf %74, %79 : vector<8x32xf32>
    %c72 = arith.constant 72 : index
    %c0_38 = arith.constant 0 : index
    %81 = vector.load %arg3[%c72, %c0_38] : memref<224x128xf32, #tpu.memory_space<vmem>>, vector<8x32xf32>
    %c80 = arith.constant 80 : index
    %c0_39 = arith.constant 0 : index
    %82 = vector.load %arg3[%c80, %c0_39] : memref<224x128xf32, #tpu.memory_space<vmem>>, vector<8x32xf32>
    %cst_40 = arith.constant dense<0.000000e+00> : vector<8xf32>
    %83 = vector.multi_reduction <add>, %80, %cst_40 [1] : vector<8x32xf32> to vector<8xf32>
    %84 = vector.shape_cast %83 : vector<8xf32> to vector<8x1xf32>
    %cst_41 = arith.constant 3.200000e+01 : f32
    %85 = vector.broadcast %cst_41 : f32 to vector<8x1xf32>
    %86 = arith.divf %84, %85 : vector<8x1xf32>
    %87 = arith.mulf %80, %80 : vector<8x32xf32>
    %cst_42 = arith.constant dense<0.000000e+00> : vector<8xf32>
    %88 = vector.multi_reduction <add>, %87, %cst_42 [1] : vector<8x32xf32> to vector<8xf32>
    %89 = vector.shape_cast %88 : vector<8xf32> to vector<8x1xf32>
    %cst_43 = arith.constant 3.200000e+01 : f32
    %90 = vector.broadcast %cst_43 : f32 to vector<8x1xf32>
    %91 = arith.divf %89, %90 : vector<8x1xf32>
    %92 = arith.mulf %86, %86 : vector<8x1xf32>
    %93 = arith.subf %91, %92 : vector<8x1xf32>
    %cst_44 = arith.constant 0.000000e+00 : f32
    %94 = vector.broadcast %cst_44 : f32 to vector<8x1xf32>
    %95 = arith.maximumf %93, %94 : vector<8x1xf32>
    %96 = vector.broadcast %86 : vector<8x1xf32> to vector<8x32xf32>
    %97 = arith.subf %80, %96 : vector<8x32xf32>
    %cst_45 = arith.constant 9.99999974E-6 : f32
    %98 = vector.broadcast %cst_45 : f32 to vector<8x1xf32>
    %99 = arith.addf %95, %98 : vector<8x1xf32>
    %100 = math.rsqrt %99 : vector<8x1xf32>
    %101 = vector.broadcast %100 : vector<8x1xf32> to vector<8x32xf32>
    %102 = arith.mulf %97, %101 : vector<8x32xf32>
    %103 = arith.mulf %102, %81 : vector<8x32xf32>
    %104 = arith.addf %103, %82 : vector<8x32xf32>
    %c32_46 = arith.constant 32 : index
    %c0_47 = arith.constant 0 : index
    %105 = vector.load %arg2[%c32_46, %c0_47] : memref<160x128xbf16, #tpu.memory_space<vmem>>, vector<32x128xbf16>
    %106 = arith.truncf %104 : vector<8x32xf32> to vector<8x32xbf16>
    %cst_48 = arith.constant dense<0.000000e+00> : vector<8x128xf32>
    %107 = tpu.matmul %106, %105, %cst_48 {dimension_numbers = #tpu.dot_dimension_numbers<[1], [0], [0], [1], [0, 0, 1, 1], [], []>} : vector<8x32xbf16>, vector<32x128xbf16>, vector<8x128xf32> -> vector<8x128xf32>
    %c88 = arith.constant 88 : index
    %c0_49 = arith.constant 0 : index
    %108 = vector.load %arg3[%c88, %c0_49] : memref<224x128xf32, #tpu.memory_space<vmem>>, vector<8x128xf32>
    %109 = arith.addf %107, %108 : vector<8x128xf32>
    %cst_50 = arith.constant 0.000000e+00 : f32
    %110 = vector.broadcast %cst_50 : f32 to vector<8x128xf32>
    %111 = arith.maximumf %109, %110 : vector<8x128xf32>
    %c272 = arith.constant 272 : index
    %c0_51 = arith.constant 0 : index
    %112 = vector.load %arg1[%c272, %c0_51] : memref<656x32xbf16, #tpu.memory_space<vmem>>, vector<128x32xbf16>
    %113 = arith.truncf %111 : vector<8x128xf32> to vector<8x128xbf16>
    %cst_52 = arith.constant dense<0.000000e+00> : vector<8x32xf32>
    %114 = tpu.matmul %113, %112, %cst_52 {dimension_numbers = #tpu.dot_dimension_numbers<[1], [0], [0], [1], [0, 0, 1, 1], [], []>} : vector<8x128xbf16>, vector<128x32xbf16>, vector<8x32xf32> -> vector<8x32xf32>
    %c96 = arith.constant 96 : index
    %c0_53 = arith.constant 0 : index
    %115 = vector.load %arg3[%c96, %c0_53] : memref<224x128xf32, #tpu.memory_space<vmem>>, vector<8x32xf32>
    %116 = arith.addf %114, %115 : vector<8x32xf32>
    %117 = arith.addf %104, %116 : vector<8x32xf32>
    %c104 = arith.constant 104 : index
    %c0_54 = arith.constant 0 : index
    %118 = vector.load %arg3[%c104, %c0_54] : memref<224x128xf32, #tpu.memory_space<vmem>>, vector<8x32xf32>
    %c112 = arith.constant 112 : index
    %c0_55 = arith.constant 0 : index
    %119 = vector.load %arg3[%c112, %c0_55] : memref<224x128xf32, #tpu.memory_space<vmem>>, vector<8x32xf32>
    %cst_56 = arith.constant dense<0.000000e+00> : vector<8xf32>
    %120 = vector.multi_reduction <add>, %117, %cst_56 [1] : vector<8x32xf32> to vector<8xf32>
    %121 = vector.shape_cast %120 : vector<8xf32> to vector<8x1xf32>
    %cst_57 = arith.constant 3.200000e+01 : f32
    %122 = vector.broadcast %cst_57 : f32 to vector<8x1xf32>
    %123 = arith.divf %121, %122 : vector<8x1xf32>
    %124 = arith.mulf %117, %117 : vector<8x32xf32>
    %cst_58 = arith.constant dense<0.000000e+00> : vector<8xf32>
    %125 = vector.multi_reduction <add>, %124, %cst_58 [1] : vector<8x32xf32> to vector<8xf32>
    %126 = vector.shape_cast %125 : vector<8xf32> to vector<8x1xf32>
    %cst_59 = arith.constant 3.200000e+01 : f32
    %127 = vector.broadcast %cst_59 : f32 to vector<8x1xf32>
    %128 = arith.divf %126, %127 : vector<8x1xf32>
    %129 = arith.mulf %123, %123 : vector<8x1xf32>
    %130 = arith.subf %128, %129 : vector<8x1xf32>
    %cst_60 = arith.constant 0.000000e+00 : f32
    %131 = vector.broadcast %cst_60 : f32 to vector<8x1xf32>
    %132 = arith.maximumf %130, %131 : vector<8x1xf32>
    %133 = vector.broadcast %123 : vector<8x1xf32> to vector<8x32xf32>
    %134 = arith.subf %117, %133 : vector<8x32xf32>
    %cst_61 = arith.constant 9.99999974E-6 : f32
    %135 = vector.broadcast %cst_61 : f32 to vector<8x1xf32>
    %136 = arith.addf %132, %135 : vector<8x1xf32>
    %137 = math.rsqrt %136 : vector<8x1xf32>
    %138 = vector.broadcast %137 : vector<8x1xf32> to vector<8x32xf32>
    %139 = arith.mulf %134, %138 : vector<8x32xf32>
    %140 = arith.mulf %139, %118 : vector<8x32xf32>
    %141 = arith.addf %140, %119 : vector<8x32xf32>
    %c80_62 = arith.constant 80 : index
    %c0_63 = arith.constant 0 : index
    %142 = vector.load %arg1[%c80_62, %c0_63] : memref<656x32xbf16, #tpu.memory_space<vmem>>, vector<32x32xbf16>
    %143 = arith.truncf %141 : vector<8x32xf32> to vector<8x32xbf16>
    %cst_64 = arith.constant dense<0.000000e+00> : vector<8x32xf32>
    %144 = tpu.matmul %143, %142, %cst_64 {dimension_numbers = #tpu.dot_dimension_numbers<[1], [0], [0], [1], [0, 0, 1, 1], [], []>} : vector<8x32xbf16>, vector<32x32xbf16>, vector<8x32xf32> -> vector<8x32xf32>
    %c120 = arith.constant 120 : index
    %c0_65 = arith.constant 0 : index
    %145 = vector.load %arg3[%c120, %c0_65] : memref<224x128xf32, #tpu.memory_space<vmem>>, vector<8x32xf32>
    %146 = arith.addf %144, %145 : vector<8x32xf32>
    %147 = arith.addf %141, %146 : vector<8x32xf32>
    %c128 = arith.constant 128 : index
    %c0_66 = arith.constant 0 : index
    %148 = vector.load %arg3[%c128, %c0_66] : memref<224x128xf32, #tpu.memory_space<vmem>>, vector<8x32xf32>
    %c136 = arith.constant 136 : index
    %c0_67 = arith.constant 0 : index
    %149 = vector.load %arg3[%c136, %c0_67] : memref<224x128xf32, #tpu.memory_space<vmem>>, vector<8x32xf32>
    %cst_68 = arith.constant dense<0.000000e+00> : vector<8xf32>
    %150 = vector.multi_reduction <add>, %147, %cst_68 [1] : vector<8x32xf32> to vector<8xf32>
    %151 = vector.shape_cast %150 : vector<8xf32> to vector<8x1xf32>
    %cst_69 = arith.constant 3.200000e+01 : f32
    %152 = vector.broadcast %cst_69 : f32 to vector<8x1xf32>
    %153 = arith.divf %151, %152 : vector<8x1xf32>
    %154 = arith.mulf %147, %147 : vector<8x32xf32>
    %cst_70 = arith.constant dense<0.000000e+00> : vector<8xf32>
    %155 = vector.multi_reduction <add>, %154, %cst_70 [1] : vector<8x32xf32> to vector<8xf32>
    %156 = vector.shape_cast %155 : vector<8xf32> to vector<8x1xf32>
    %cst_71 = arith.constant 3.200000e+01 : f32
    %157 = vector.broadcast %cst_71 : f32 to vector<8x1xf32>
    %158 = arith.divf %156, %157 : vector<8x1xf32>
    %159 = arith.mulf %153, %153 : vector<8x1xf32>
    %160 = arith.subf %158, %159 : vector<8x1xf32>
    %cst_72 = arith.constant 0.000000e+00 : f32
    %161 = vector.broadcast %cst_72 : f32 to vector<8x1xf32>
    %162 = arith.maximumf %160, %161 : vector<8x1xf32>
    %163 = vector.broadcast %153 : vector<8x1xf32> to vector<8x32xf32>
    %164 = arith.subf %147, %163 : vector<8x32xf32>
    %cst_73 = arith.constant 9.99999974E-6 : f32
    %165 = vector.broadcast %cst_73 : f32 to vector<8x1xf32>
    %166 = arith.addf %162, %165 : vector<8x1xf32>
    %167 = math.rsqrt %166 : vector<8x1xf32>
    %168 = vector.broadcast %167 : vector<8x1xf32> to vector<8x32xf32>
    %169 = arith.mulf %164, %168 : vector<8x32xf32>
    %170 = arith.mulf %169, %148 : vector<8x32xf32>
    %171 = arith.addf %170, %149 : vector<8x32xf32>
    %c64_74 = arith.constant 64 : index
    %c0_75 = arith.constant 0 : index
    %172 = vector.load %arg2[%c64_74, %c0_75] : memref<160x128xbf16, #tpu.memory_space<vmem>>, vector<32x128xbf16>
    %173 = arith.truncf %171 : vector<8x32xf32> to vector<8x32xbf16>
    %cst_76 = arith.constant dense<0.000000e+00> : vector<8x128xf32>
    %174 = tpu.matmul %173, %172, %cst_76 {dimension_numbers = #tpu.dot_dimension_numbers<[1], [0], [0], [1], [0, 0, 1, 1], [], []>} : vector<8x32xbf16>, vector<32x128xbf16>, vector<8x128xf32> -> vector<8x128xf32>
    %c144_77 = arith.constant 144 : index
    %c0_78 = arith.constant 0 : index
    %175 = vector.load %arg3[%c144_77, %c0_78] : memref<224x128xf32, #tpu.memory_space<vmem>>, vector<8x128xf32>
    %176 = arith.addf %174, %175 : vector<8x128xf32>
    %cst_79 = arith.constant 0.000000e+00 : f32
    %177 = vector.broadcast %cst_79 : f32 to vector<8x128xf32>
    %178 = arith.maximumf %176, %177 : vector<8x128xf32>
    %c400 = arith.constant 400 : index
    %c0_80 = arith.constant 0 : index
    %179 = vector.load %arg1[%c400, %c0_80] : memref<656x32xbf16, #tpu.memory_space<vmem>>, vector<128x32xbf16>
    %180 = arith.truncf %178 : vector<8x128xf32> to vector<8x128xbf16>
    %cst_81 = arith.constant dense<0.000000e+00> : vector<8x32xf32>
    %181 = tpu.matmul %180, %179, %cst_81 {dimension_numbers = #tpu.dot_dimension_numbers<[1], [0], [0], [1], [0, 0, 1, 1], [], []>} : vector<8x128xbf16>, vector<128x32xbf16>, vector<8x32xf32> -> vector<8x32xf32>
    %c152 = arith.constant 152 : index
    %c0_82 = arith.constant 0 : index
    %182 = vector.load %arg3[%c152, %c0_82] : memref<224x128xf32, #tpu.memory_space<vmem>>, vector<8x32xf32>
    %183 = arith.addf %181, %182 : vector<8x32xf32>
    %184 = arith.addf %171, %183 : vector<8x32xf32>
    %c160 = arith.constant 160 : index
    %c0_83 = arith.constant 0 : index
    %185 = vector.load %arg3[%c160, %c0_83] : memref<224x128xf32, #tpu.memory_space<vmem>>, vector<8x32xf32>
    %c168 = arith.constant 168 : index
    %c0_84 = arith.constant 0 : index
    %186 = vector.load %arg3[%c168, %c0_84] : memref<224x128xf32, #tpu.memory_space<vmem>>, vector<8x32xf32>
    %cst_85 = arith.constant dense<0.000000e+00> : vector<8xf32>
    %187 = vector.multi_reduction <add>, %184, %cst_85 [1] : vector<8x32xf32> to vector<8xf32>
    %188 = vector.shape_cast %187 : vector<8xf32> to vector<8x1xf32>
    %cst_86 = arith.constant 3.200000e+01 : f32
    %189 = vector.broadcast %cst_86 : f32 to vector<8x1xf32>
    %190 = arith.divf %188, %189 : vector<8x1xf32>
    %191 = arith.mulf %184, %184 : vector<8x32xf32>
    %cst_87 = arith.constant dense<0.000000e+00> : vector<8xf32>
    %192 = vector.multi_reduction <add>, %191, %cst_87 [1] : vector<8x32xf32> to vector<8xf32>
    %193 = vector.shape_cast %192 : vector<8xf32> to vector<8x1xf32>
    %cst_88 = arith.constant 3.200000e+01 : f32
    %194 = vector.broadcast %cst_88 : f32 to vector<8x1xf32>
    %195 = arith.divf %193, %194 : vector<8x1xf32>
    %196 = arith.mulf %190, %190 : vector<8x1xf32>
    %197 = arith.subf %195, %196 : vector<8x1xf32>
    %cst_89 = arith.constant 0.000000e+00 : f32
    %198 = vector.broadcast %cst_89 : f32 to vector<8x1xf32>
    %199 = arith.maximumf %197, %198 : vector<8x1xf32>
    %200 = vector.broadcast %190 : vector<8x1xf32> to vector<8x32xf32>
    %201 = arith.subf %184, %200 : vector<8x32xf32>
    %cst_90 = arith.constant 9.99999974E-6 : f32
    %202 = vector.broadcast %cst_90 : f32 to vector<8x1xf32>
    %203 = arith.addf %199, %202 : vector<8x1xf32>
    %204 = math.rsqrt %203 : vector<8x1xf32>
    %205 = vector.broadcast %204 : vector<8x1xf32> to vector<8x32xf32>
    %206 = arith.mulf %201, %205 : vector<8x32xf32>
    %207 = arith.mulf %206, %185 : vector<8x32xf32>
    %208 = arith.addf %207, %186 : vector<8x32xf32>
    %c112_91 = arith.constant 112 : index
    %c0_92 = arith.constant 0 : index
    %209 = vector.load %arg1[%c112_91, %c0_92] : memref<656x32xbf16, #tpu.memory_space<vmem>>, vector<32x32xbf16>
    %210 = arith.truncf %208 : vector<8x32xf32> to vector<8x32xbf16>
    %cst_93 = arith.constant dense<0.000000e+00> : vector<8x32xf32>
    %211 = tpu.matmul %210, %209, %cst_93 {dimension_numbers = #tpu.dot_dimension_numbers<[1], [0], [0], [1], [0, 0, 1, 1], [], []>} : vector<8x32xbf16>, vector<32x32xbf16>, vector<8x32xf32> -> vector<8x32xf32>
    %c176 = arith.constant 176 : index
    %c0_94 = arith.constant 0 : index
    %212 = vector.load %arg3[%c176, %c0_94] : memref<224x128xf32, #tpu.memory_space<vmem>>, vector<8x32xf32>
    %213 = arith.addf %211, %212 : vector<8x32xf32>
    %214 = arith.addf %208, %213 : vector<8x32xf32>
    %c184 = arith.constant 184 : index
    %c0_95 = arith.constant 0 : index
    %215 = vector.load %arg3[%c184, %c0_95] : memref<224x128xf32, #tpu.memory_space<vmem>>, vector<8x32xf32>
    %c192 = arith.constant 192 : index
    %c0_96 = arith.constant 0 : index
    %216 = vector.load %arg3[%c192, %c0_96] : memref<224x128xf32, #tpu.memory_space<vmem>>, vector<8x32xf32>
    %cst_97 = arith.constant dense<0.000000e+00> : vector<8xf32>
    %217 = vector.multi_reduction <add>, %214, %cst_97 [1] : vector<8x32xf32> to vector<8xf32>
    %218 = vector.shape_cast %217 : vector<8xf32> to vector<8x1xf32>
    %cst_98 = arith.constant 3.200000e+01 : f32
    %219 = vector.broadcast %cst_98 : f32 to vector<8x1xf32>
    %220 = arith.divf %218, %219 : vector<8x1xf32>
    %221 = arith.mulf %214, %214 : vector<8x32xf32>
    %cst_99 = arith.constant dense<0.000000e+00> : vector<8xf32>
    %222 = vector.multi_reduction <add>, %221, %cst_99 [1] : vector<8x32xf32> to vector<8xf32>
    %223 = vector.shape_cast %222 : vector<8xf32> to vector<8x1xf32>
    %cst_100 = arith.constant 3.200000e+01 : f32
    %224 = vector.broadcast %cst_100 : f32 to vector<8x1xf32>
    %225 = arith.divf %223, %224 : vector<8x1xf32>
    %226 = arith.mulf %220, %220 : vector<8x1xf32>
    %227 = arith.subf %225, %226 : vector<8x1xf32>
    %cst_101 = arith.constant 0.000000e+00 : f32
    %228 = vector.broadcast %cst_101 : f32 to vector<8x1xf32>
    %229 = arith.maximumf %227, %228 : vector<8x1xf32>
    %230 = vector.broadcast %220 : vector<8x1xf32> to vector<8x32xf32>
    %231 = arith.subf %214, %230 : vector<8x32xf32>
    %cst_102 = arith.constant 9.99999974E-6 : f32
    %232 = vector.broadcast %cst_102 : f32 to vector<8x1xf32>
    %233 = arith.addf %229, %232 : vector<8x1xf32>
    %234 = math.rsqrt %233 : vector<8x1xf32>
    %235 = vector.broadcast %234 : vector<8x1xf32> to vector<8x32xf32>
    %236 = arith.mulf %231, %235 : vector<8x32xf32>
    %237 = arith.mulf %236, %215 : vector<8x32xf32>
    %238 = arith.addf %237, %216 : vector<8x32xf32>
    %c96_103 = arith.constant 96 : index
    %c0_104 = arith.constant 0 : index
    %239 = vector.load %arg2[%c96_103, %c0_104] : memref<160x128xbf16, #tpu.memory_space<vmem>>, vector<32x128xbf16>
    %240 = arith.truncf %238 : vector<8x32xf32> to vector<8x32xbf16>
    %cst_105 = arith.constant dense<0.000000e+00> : vector<8x128xf32>
    %241 = tpu.matmul %240, %239, %cst_105 {dimension_numbers = #tpu.dot_dimension_numbers<[1], [0], [0], [1], [0, 0, 1, 1], [], []>} : vector<8x32xbf16>, vector<32x128xbf16>, vector<8x128xf32> -> vector<8x128xf32>
    %c200 = arith.constant 200 : index
    %c0_106 = arith.constant 0 : index
    %242 = vector.load %arg3[%c200, %c0_106] : memref<224x128xf32, #tpu.memory_space<vmem>>, vector<8x128xf32>
    %243 = arith.addf %241, %242 : vector<8x128xf32>
    %cst_107 = arith.constant 0.000000e+00 : f32
    %244 = vector.broadcast %cst_107 : f32 to vector<8x128xf32>
    %245 = arith.maximumf %243, %244 : vector<8x128xf32>
    %c528 = arith.constant 528 : index
    %c0_108 = arith.constant 0 : index
    %246 = vector.load %arg1[%c528, %c0_108] : memref<656x32xbf16, #tpu.memory_space<vmem>>, vector<128x32xbf16>
    %247 = arith.truncf %245 : vector<8x128xf32> to vector<8x128xbf16>
    %cst_109 = arith.constant dense<0.000000e+00> : vector<8x32xf32>
    %248 = tpu.matmul %247, %246, %cst_109 {dimension_numbers = #tpu.dot_dimension_numbers<[1], [0], [0], [1], [0, 0, 1, 1], [], []>} : vector<8x128xbf16>, vector<128x32xbf16>, vector<8x32xf32> -> vector<8x32xf32>
    %c208 = arith.constant 208 : index
    %c0_110 = arith.constant 0 : index
    %249 = vector.load %arg3[%c208, %c0_110] : memref<224x128xf32, #tpu.memory_space<vmem>>, vector<8x32xf32>
    %250 = arith.addf %248, %249 : vector<8x32xf32>
    %251 = arith.addf %238, %250 : vector<8x32xf32>
    %cst_111 = arith.constant dense<0.000000e+00> : vector<8xf32>
    %252 = vector.multi_reduction <add>, %251, %cst_111 [1] : vector<8x32xf32> to vector<8xf32>
    %253 = vector.shape_cast %252 : vector<8xf32> to vector<8x1xf32>
    %cst_112 = arith.constant 3.200000e+01 : f32
    %254 = vector.broadcast %cst_112 : f32 to vector<8x1xf32>
    %255 = arith.divf %253, %254 : vector<8x1xf32>
    %256 = arith.mulf %251, %251 : vector<8x32xf32>
    %cst_113 = arith.constant dense<0.000000e+00> : vector<8xf32>
    %257 = vector.multi_reduction <add>, %256, %cst_113 [1] : vector<8x32xf32> to vector<8xf32>
    %258 = vector.shape_cast %257 : vector<8xf32> to vector<8x1xf32>
    %cst_114 = arith.constant 3.200000e+01 : f32
    %259 = vector.broadcast %cst_114 : f32 to vector<8x1xf32>
    %260 = arith.divf %258, %259 : vector<8x1xf32>
    %261 = arith.mulf %255, %255 : vector<8x1xf32>
    %262 = arith.subf %260, %261 : vector<8x1xf32>
    %cst_115 = arith.constant 0.000000e+00 : f32
    %263 = vector.broadcast %cst_115 : f32 to vector<8x1xf32>
    %264 = arith.maximumf %262, %263 : vector<8x1xf32>
    %265 = vector.broadcast %255 : vector<8x1xf32> to vector<8x32xf32>
    %266 = arith.subf %251, %265 : vector<8x32xf32>
    %cst_116 = arith.constant 9.99999974E-6 : f32
    %267 = vector.broadcast %cst_116 : f32 to vector<8x1xf32>
    %268 = arith.addf %264, %267 : vector<8x1xf32>
    %269 = math.rsqrt %268 : vector<8x1xf32>
    %270 = vector.broadcast %269 : vector<8x1xf32> to vector<8x32xf32>
    %271 = arith.mulf %266, %270 : vector<8x32xf32>
    %c128_117 = arith.constant 128 : index
    %c0_118 = arith.constant 0 : index
    %272 = vector.load %arg2[%c128_117, %c0_118] : memref<160x128xbf16, #tpu.memory_space<vmem>>, vector<32x128xbf16>
    %273 = arith.truncf %271 : vector<8x32xf32> to vector<8x32xbf16>
    %cst_119 = arith.constant dense<0.000000e+00> : vector<8x128xf32>
    %274 = tpu.matmul %273, %272, %cst_119 {dimension_numbers = #tpu.dot_dimension_numbers<[1], [0], [0], [1], [0, 0, 1, 1], [], []>} : vector<8x32xbf16>, vector<32x128xbf16>, vector<8x128xf32> -> vector<8x128xf32>
    %c216 = arith.constant 216 : index
    %c0_120 = arith.constant 0 : index
    %275 = vector.load %arg3[%c216, %c0_120] : memref<224x128xf32, #tpu.memory_space<vmem>>, vector<8x128xf32>
    %276 = arith.addf %274, %275 : vector<8x128xf32>
    %c0_121 = arith.constant 0 : index
    %c0_122 = arith.constant 0 : index
    %277 = vector.load %arg4[%c0_121, %c0_122] : memref<8x128xf32, #tpu.memory_space<vmem>>, vector<8x128xf32>
    tpu.vector_store %arg4[%c0_121, %c0_122], %276 {strides = array<i32>} : memref<8x128xf32, #tpu.memory_space<vmem>>, vector<8x128xf32>,
    return
  }
}

</mosaic_0001>

<bundles_post_ra>
// kernel: _lambda_.1
= control target key start
LH: loop header
LB: loop body
LE: loop exit
PB: predicated region body
PF: predicated region fallthrough
CT: control target
= control target key end

     0   :  { %9 = vsyncpa [#allocation3], 0  ;;  %s1472_s0 = inlined_call_operand.hbm [shape: f32[8,16], index: 0, kind: input, shape index: {}]   ;;  %s1473_s1 = inlined_call_operand.hbm [shape: bf16[656,32], index: 1, kind: input, shape index: {}]   ;;  %s1474_s2 = inlined_call_operand.hbm [shape: bf16[160,128], index: 2, kind: input, shape index: {}]   ;;  %s1475_s3 = inlined_call_operand.hbm [shape: f32[224,128], index: 3, kind: input, shape index: {}]   ;;  %s1476_s4 = inlined_call_operand.vmem [shape: f32[8,128], index: 4, kind: output, shape index: {}]  }
   0x1   :  { %10 = vsyncpa [#allocation5], 0  ;;  %s27_s17 = sshll.u32 %s1473_s1, 4  ;;  %s28_s17 = int_to_ptr.hbm [resolvable:$true] %s27_s17 }
   0x2   :  { %11 = vsyncpa [#allocation8], 0  ;;  %s1380_s18 = smov [#allocation4]   ;;  %s17_s22 = sshll.u32 %s1472_s0, 4  ;;  %s18_s22 = int_to_ptr.hbm [resolvable:$true] %s17_s22 }
   0x3   :  { %s29_s19 = sshll.u32 %s1380_s18, 4  ;;  %s1381_s23 = smov 64   ;;  %s30_s19 = int_to_ptr.vmem [resolvable:$true] %s29_s19 }
   0x4   :  { %s1382_s24 = smov 4   ;;  %s1383_s25 = smov [#allocation2]  }
   0x5   :  { %35 = dma.hbm_to_vmem [thread:$0]  %s28_s17, 5248, %s30_s19, [#allocation5], %s1381_s23, %s1381_s23, %s1382_s24  }
   0x6   :  { %s19_s26 = sshll.u32 %s1383_s25, 4  ;;  %s40_s29 = sshll.u32 %s1474_s2, 4  ;;  %s20_s26 = int_to_ptr.vmem [resolvable:$true] %s19_s26  ;;  %s41_s29 = int_to_ptr.hbm [resolvable:$true] %s40_s29 }
   0x7   :  { %22 = dma.hbm_to_vmem [thread:$0]  %s18_s22, 128, %s20_s26, [#allocation3]  }
   0x8   :  { %s53_s5 = sshll.u32 %s1475_s3, 4  ;;  %s1384_s6 = smov [#allocation6]   ;;  %s54_s5 = int_to_ptr.hbm [resolvable:$true] %s53_s5 }
   0x9   :  { %s42_s7 = sshll.u32 %s1384_s6, 4  ;;  %s1385_s0 = smov [#allocation7]   ;;  %s43_s7 = int_to_ptr.vmem [resolvable:$true] %s42_s7 }
   0xa   :  { %48 = dma.hbm_to_vmem [thread:$0]  %s41_s29, 1280, %s43_s7, [#allocation5], %s1381_s23, %s1381_s23, %s1382_s24  }
   0xb   :  { %s55_s8 = sshll.u32 %s1385_s0, 4  ;;  %s1386_s9 = smov 128   ;;  %s56_s8 = int_to_ptr.vmem [resolvable:$true] %s55_s8 }
   0xc   :  { %s1387_s10 = smov 8  }
   0xd   :  { %61 = dma.hbm_to_vmem [thread:$0]  %s54_s5, 3584, %s56_s8, [#allocation8], %s1386_s9, %s1386_s9, %s1387_s10  }
   0xe   :  { %1374 = dma.done.wait [#allocation3], 128  }
   0xf   :  { %1375 = vsyncadd [#allocation3], 4294967168 }
  0x10   :  { %1376 = dma.done.wait [#allocation5], 6528  }
  0x11   :  { %1377 = vsyncadd [#allocation5], 4294960768 }
  0x12   :  { %1378 = dma.done.wait [#allocation8], 3584  }
  0x13   :  { %1379 = vsyncadd [#allocation8], 4294963712  ;;  %v1200_v0 = vld [vmem:[#allocation4] sm:$0xff]  ;;  %v79_v1 = vld [vmem:[#allocation2] sm:$0xff]  ;;  %vm90_vm0 = vcmask 130048   ;;  %vm126_vm1 = vcmask 261120  }
  0x14   :  { %v80_v2 = vpack.c.bf16 %v79_v1, %v79_v1  ;;  %101 = vmatpush.bf16.msra.mxu0 %v1200_v0  ;;  %v1202_v3 = vld [vmem:[#allocation4 + $0x10] sm:$0xff]  ;;  %v1201_v4 = vld [vmem:[#allocation4 + $0x8] sm:$0xff]  ;;  %v83_v5 = vld [vmem:[#allocation7] sm:$0xff]  ;;  %v1388_v19 = vmov 32.0  }
  0x15   :  { %136 = vmatpush.bf16.msra.mxu1 %v1202_v3  ;;  %v113_v11 = vld [vmem:[#allocation7 + $0x8] sm:$0xff]  ;;  %1260 = vrcp.f32 %v1388_v19  ;;  %v1204_v26 = vld [vmem:[#allocation6 + $0x8] sm:$0xff]  ;;  %v1203_v28 = vld [vmem:[#allocation6] sm:$0xff] }
  0x16   :  { %207 = vmatpush.bf16.msra.mxu2 %v1204_v26  ;;  %v1212_v34 = vld [vmem:[#allocation4 + $0x80] sm:$0xff]  ;;  %v1211_v36 = vld [vmem:[#allocation4 + $0x78] sm:$0xff]  ;;  %v1210_v38 = vld [vmem:[#allocation4 + $0x70] sm:$0xff] }
  0x17   :  { %990 = vmatmul.msk.bf16.vlgmr.msra.gmra.mxu0 %vm90_vm0, %v80_v2  ;;  %281 = vmatpush.bf16.msra.mxu3 %v1212_v34  ;;  %v1209_v39 = vld [vmem:[#allocation4 + $0x68] sm:$0xff]  ;;  %v1208_v42 = vld [vmem:[#allocation4 + $0x60] sm:$0xff]  ;;  %v1207_v45 = vld [vmem:[#allocation4 + $0x58] sm:$0xff] }
  0x18   :  { %v144_v49 = vld [vmem:[#allocation7 + $0x10] sm:$0xff]  ;;  %v145_v52 = vld [vmem:[#allocation7 + $0x18] sm:$0xff]  ;;  %v185_v58 = vld [vmem:[#allocation7 + $0x20] sm:$0xff] }
  0x19   :  { %137 = vmatpush.bf16.msra.mxu1 %v1201_v4  ;;  %v1206_v56 = vld [vmem:[#allocation4 + $0x50] sm:$0xff]  ;;  %v1205_v57 = vld [vmem:[#allocation4 + $0x48] sm:$0xff]  ;;  %v232_v0 = vld [vmem:[#allocation7 + $0x28] sm:$0xff] }
  0x1a   :  { %208 = vmatpush.bf16.msra.mxu2 %v1203_v28  ;;  %v295_v26 = vld [vmem:[#allocation7 + $0x30] sm:$0xff] }
  0x1b   :  { %v1261_v20 = vpop.eup %1260  ;;  %282 = vmatpush.bf16.msra.mxu3 %v1211_v36 }
  0x1c   :  { %v150_v21 = vmul.f32 32.0, %v1261_v20  ;;  %vm154_vm2 = vweird.f32 %v1261_v20 }
  0x1e   :  { %v151_v22 = vsub.f32 1.0, %v150_v21 }
  0x1f   :  { %283 = vmatpush.bf16.msra.mxu3 %v1210_v38 }
  0x20   :  { %v152_v23 = vmul.f32 %v1261_v20, %v151_v22 }
  0x22   :  { %v153_v24 = vadd.f32 %v1261_v20, %v152_v23 }
  0x23   :  { %284 = vmatpush.bf16.msra.mxu3 %v1209_v39 }
  0x24   :  { %v1429_v27 = vsel %vm154_vm2, %v1261_v20, %v153_v24 }
  0x27   :  { %285 = vmatpush.bf16.msra.mxu3 %v1208_v42  ;;  %v1216_v42 = vld [vmem:[#allocation6 + $0x18] sm:$0xff] }
  0x28   :  { %415 = vmatpush.bf16.msrb.mxu1 %v1216_v42 }
  0x2b   :  { %286 = vmatpush.bf16.msra.mxu3 %v1207_v45 }
  0x2f   :  { %287 = vmatpush.bf16.msra.mxu3 %v1206_v56 }
  0x33   :  { %288 = vmatpush.bf16.msra.mxu3 %v1205_v57  ;;  %v1220_v57 = vld [vmem:[#allocation4 + $0xa0] sm:$0xff] }
  0x94   :  { %v103_v6 = vpop.f32.mrf.mxu0 }
  0x95   :  { %v104_v7 = vadd.f32 %v103_v6, %v83_v5 }
  0x97   :  { %v107_v8 = vmax.f32 %v104_v7, 0.0 }
  0x99   :  { %v112_v9 = vpack.c.bf16 %v107_v8, %v107_v8 }
  0x9b   :  { %999 = vmatmul.msk.bf16.vlgmr.msra.gmra.mxu1 %vm126_vm1, %v112_v9  ;;  %v1214_v9 = vld [vmem:[#allocation4 + $0x20] sm:$0xff] }
  0x9c   :  { %v105_v10 = vpop.f32.mrf.mxu0  ;;  %351 = vmatpush.bf16.msrb.mxu0 %v1214_v9  ;;  %v393_v9 = vld [vmem:[#allocation7 + $0x58] sm:$0xff] }
  0x9d   :  { %v1213_v10 = vld [vmem:[#allocation4 + $0x18] sm:$0xff] }
  0xa0   :  { %352 = vmatpush.bf16.msrb.mxu0 %v1213_v10 }
 0x118   :  { %v139_v12 = vpop.f32.mrf.mxu1 }
 0x119   :  { %v140_v13 = vadd.f32 %v139_v12, %v113_v11 }
 0x11b   :  { %v143_v14 = vadd.f32 %v140_v13, %v107_v8 }
 0x11d   :  { %v146_v15 = vsel %vm126_vm1, %v143_v14, 0.0  ;;  %v157_v17 = vmul.f32 %v143_v14, %v143_v14 }
 0x11e   :  { %147 = vadd.xlane.f32.xlu0 %v146_v15 }
 0x11f   :  { %v158_v18 = vsel %vm126_vm1, %v157_v17, 0.0 }
 0x120   :  { %v141_v16 = vpop.f32.mrf.mxu1 }
 0x126   :  { %159 = vadd.xlane.f32.xlu0 %v158_v18 }
 0x191   :  { %v148_v25 = vpop.xlane.xlu0 %147 }
 0x192   :  { %v156_v29 = vmul.f32 %v1429_v27, %v148_v25 }
 0x194   :  { %v162_v31 = vmul.f32 %v156_v29, %v156_v29  ;;  %v165_v48 = vsub.f32 %v143_v14, %v156_v29  ;;  %v296_v29 = vld [vmem:[#allocation7 + $0x38] sm:$0xff] }
 0x199   :  { %v160_v30 = vpop.xlane.xlu0 %159 }
 0x19a   :  { %v161_v32 = vmul.f32 %v160_v30, %v1429_v27 }
 0x19c   :  { %v163_v33 = vsub.f32 %v161_v32, %v162_v31 }
 0x19e   :  { %v164_v35 = vmax.f32 %v163_v33, 0.0  ;;  %v329_v33 = vld [vmem:[#allocation7 + $0x40] sm:$0xff] }
 0x1a0   :  { %v166_v37 = vadd.f32 1e-05, %v164_v35 }
 0x1a2   :  { %1262 = vrsqrt.f32 %v166_v37  ;;  %vm173_vm4 = vweird.f32 %v166_v37 }
 0x1a8   :  { %v1263_v40 = vpop.eup %1262 }
 0x1a9   :  { %v168_v41 = vmul.f32 %v1263_v40, %v166_v37  ;;  %vm174_vm3 = vweird.f32 %v1263_v40 }
 0x1aa   :  { %vm175_vm5 = vmor %vm173_vm4, %vm174_vm3 }
 0x1ab   :  { %v169_v43 = vmul.f32 %v1263_v40, %v168_v41 }
 0x1ad   :  { %v170_v44 = vmul.f32 0.5, %v169_v43  ;;  %v1215_v43 = vld [vmem:[#allocation6 + $0x10] sm:$0xff] }
 0x1ae   :  { %416 = vmatpush.bf16.msrb.mxu1 %v1215_v43 }
 0x1af   :  { %v171_v46 = vsub.f32 1.5, %v170_v44 }
 0x1b1   :  { %v172_v47 = vmul.f32 %v1263_v40, %v171_v46 }
 0x1b3   :  { %v176_v50 = vsel %vm175_vm5, %v1263_v40, %v172_v47 }
 0x1b4   :  { %v177_v51 = vmul.f32 %v176_v50, %v165_v48 }
 0x1b6   :  { %v178_v53 = vmul.f32 %v177_v51, %v144_v49  ;;  %v1224_v49 = vld [vmem:[#allocation4 + $0xc0] sm:$0xff]  ;;  %v1223_v51 = vld [vmem:[#allocation4 + $0xb8] sm:$0xff] }
 0x1b7   :  { %489 = vmatpush.bf16.msrb.mxu2 %v1224_v49 }
 0x1b8   :  { %v179_v54 = vadd.f32 %v178_v53, %v145_v52  ;;  %v1222_v53 = vld [vmem:[#allocation4 + $0xb0] sm:$0xff] }
 0x1ba   :  { %v184_v55 = vpack.c.bf16 %v179_v54, %v179_v54 }
 0x1bb   :  { %490 = vmatpush.bf16.msrb.mxu2 %v1223_v51 }
 0x1bc   :  { %1008 = vmatmul.msk.bf16.vlgmr.msra.gmra.mxu2 %vm126_vm1, %v184_v55 }
 0x1bf   :  { %491 = vmatpush.bf16.msrb.mxu2 %v1222_v53 }
 0x23f   :  { %v210_v59 = vpop.f32.mrf.mxu2 }
 0x240   :  { %v211_v60 = vadd.f32 %v210_v59, %v185_v58 }
 0x242   :  { %v214_v61 = vmax.f32 %v211_v60, 0.0  ;;  %v1219_v60 = vld [vmem:[#allocation4 + $0x98] sm:$0xff] }
 0x244   :  { %v231_v62 = vpack.c.bf16 %v214_v61, %v214_v61 }
 0x246   :  { %289 = vmatmul.bf16.vlgmr.msra.gmra.mxu3 %v231_v62 }
 0x247   :  { %v212_v63 = vpop.f32.mrf.mxu2 }
 0x2c9   :  { %v290_v1 = vpop.f32.mrf.mxu3 }
 0x2ca   :  { %v291_v2 = vadd.f32 %v290_v1, %v232_v0  ;;  %v359_v1 = vld [vmem:[#allocation7 + $0x48] sm:$0xff] }
 0x2cc   :  { %v294_v3 = vadd.f32 %v291_v2, %v179_v54  ;;  %v1221_v54 = vld [vmem:[#allocation4 + $0xa8] sm:$0xff] }
 0x2cd   :  { %492 = vmatpush.bf16.msrb.mxu2 %v1221_v54 }
 0x2ce   :  { %v297_v4 = vsel %vm126_vm1, %v294_v3, 0.0  ;;  %v301_v6 = vmul.f32 %v294_v3, %v294_v3 }
 0x2cf   :  { %298 = vadd.xlane.f32.xlu1 %v297_v4 }
 0x2d0   :  { %v302_v7 = vsel %vm126_vm1, %v301_v6, 0.0 }
 0x2d1   :  { %v292_v5 = vpop.f32.mrf.mxu3  ;;  %493 = vmatpush.bf16.msrb.mxu2 %v1220_v57  ;;  %v1227_v57 = vld [vmem:[#allocation6 + $0x20] sm:$0xff] }
 0x2d5   :  { %494 = vmatpush.bf16.msrb.mxu2 %v1219_v60 }
 0x2d7   :  { %303 = vadd.xlane.f32.xlu1 %v302_v7  ;;  %v1218_v7 = vld [vmem:[#allocation4 + $0x90] sm:$0xff] }
 0x2d9   :  { %495 = vmatpush.bf16.msrb.mxu2 %v1218_v7 }
 0x342   :  { %v299_v8 = vpop.xlane.xlu1 %298 }
 0x343   :  { %v300_v11 = vmul.f32 %v299_v8, %v1429_v27  ;;  %v1217_v8 = vld [vmem:[#allocation4 + $0x88] sm:$0xff] }
 0x344   :  { %496 = vmatpush.bf16.msrb.mxu2 %v1217_v8  ;;  %v1232_v8 = vld [vmem:[#allocation4 + $0xe0] sm:$0xff] }
 0x345   :  { %v306_v13 = vmul.f32 %v300_v11, %v300_v11  ;;  %v309_v24 = vsub.f32 %v294_v3, %v300_v11  ;;  %v360_v3 = vld [vmem:[#allocation7 + $0x50] sm:$0xff] }
 0x34a   :  { %v304_v12 = vpop.xlane.xlu1 %303 }
 0x34b   :  { %v305_v14 = vmul.f32 %v304_v12, %v1429_v27 }
 0x34d   :  { %v307_v15 = vsub.f32 %v305_v14, %v306_v13 }
 0x34f   :  { %v308_v16 = vmax.f32 %v307_v15, 0.0  ;;  %v440_v15 = vld [vmem:[#allocation7 + $0x60] sm:$0xff] }
 0x351   :  { %v310_v17 = vadd.f32 1e-05, %v308_v16 }
 0x353   :  { %1264 = vrsqrt.f32 %v310_v17  ;;  %vm317_vm7 = vweird.f32 %v310_v17 }
 0x359   :  { %v1265_v18 = vpop.eup %1264 }
 0x35a   :  { %v312_v19 = vmul.f32 %v1265_v18, %v310_v17  ;;  %vm318_vm6 = vweird.f32 %v1265_v18 }
 0x35b   :  { %vm319_vm8 = vmor %vm317_vm7, %vm318_vm6 }
 0x35c   :  { %v313_v20 = vmul.f32 %v1265_v18, %v312_v19 }
 0x35e   :  { %v314_v21 = vmul.f32 0.5, %v313_v20 }
 0x360   :  { %v315_v22 = vsub.f32 1.5, %v314_v21 }
 0x362   :  { %v316_v23 = vmul.f32 %v1265_v18, %v315_v22 }
 0x364   :  { %v320_v25 = vsel %vm319_vm8, %v1265_v18, %v316_v23  ;;  %v1226_v23 = vld [vmem:[#allocation4 + $0x30] sm:$0xff] }
 0x365   :  { %v321_v28 = vmul.f32 %v320_v25, %v309_v24  ;;  %559 = vmatpush.bf16.msra.mxu0 %v1226_v23  ;;  %v1225_v24 = vld [vmem:[#allocation4 + $0x28] sm:$0xff] }
 0x366   :  { %v1229_v23 = vld [vmem:[#allocation4 + $0xc8] sm:$0xff] }
 0x367   :  { %v322_v30 = vmul.f32 %v321_v28, %v295_v26 }
 0x369   :  { %v323_v31 = vadd.f32 %v322_v30, %v296_v29  ;;  %560 = vmatpush.bf16.msra.mxu0 %v1225_v24  ;;  %v601_v24 = vld [vmem:[#allocation7 + $0x90] sm:$0xff] }
 0x36b   :  { %v328_v32 = vpack.c.bf16 %v323_v31, %v323_v31 }
 0x36d   :  { %1049 = vmatmul.msk.bf16.vlgmr.msrb.gmra.mxu0 %vm126_vm1, %v328_v32 }
 0x3ea   :  { %v354_v34 = vpop.f32.mrf.mxu0 }
 0x3eb   :  { %v355_v35 = vadd.f32 %v354_v34, %v329_v33 }
 0x3ed   :  { %v358_v36 = vadd.f32 %v355_v35, %v323_v31 }
 0x3ef   :  { %v361_v37 = vsel %vm126_vm1, %v358_v36, 0.0  ;;  %v365_v39 = vmul.f32 %v358_v36, %v358_v36 }
 0x3f0   :  { %362 = vadd.xlane.f32.xlu2 %v361_v37 }
 0x3f1   :  { %v366_v40 = vsel %vm126_vm1, %v365_v39, 0.0 }
 0x3f2   :  { %v356_v38 = vpop.f32.mrf.mxu0 }
 0x3f8   :  { %367 = vadd.xlane.f32.xlu2 %v366_v40 }
 0x463   :  { %v363_v41 = vpop.xlane.xlu2 %362 }
 0x464   :  { %v364_v44 = vmul.f32 %v363_v41, %v1429_v27  ;;  %v503_v41 = vld [vmem:[#allocation7 + $0x68] sm:$0xff] }
 0x466   :  { %v370_v46 = vmul.f32 %v364_v44, %v364_v44  ;;  %v373_v63 = vsub.f32 %v358_v36, %v364_v44  ;;  %v504_v44 = vld [vmem:[#allocation7 + $0x70] sm:$0xff] }
 0x46b   :  { %v368_v45 = vpop.xlane.xlu2 %367 }
 0x46c   :  { %v369_v47 = vmul.f32 %v368_v45, %v1429_v27 }
 0x46e   :  { %v371_v48 = vsub.f32 %v369_v47, %v370_v46 }
 0x470   :  { %v372_v50 = vmax.f32 %v371_v48, 0.0  ;;  %v537_v48 = vld [vmem:[#allocation7 + $0x78] sm:$0xff] }
 0x472   :  { %v374_v52 = vadd.f32 1e-05, %v372_v50 }
 0x474   :  { %1266 = vrsqrt.f32 %v374_v52  ;;  %vm381_vm10 = vweird.f32 %v374_v52 }
 0x47a   :  { %v1267_v55 = vpop.eup %1266 }
 0x47b   :  { %v376_v56 = vmul.f32 %v1267_v55, %v374_v52  ;;  %vm382_vm9 = vweird.f32 %v1267_v55 }
 0x47c   :  { %vm383_vm11 = vmor %vm381_vm10, %vm382_vm9 }
 0x47d   :  { %v377_v58 = vmul.f32 %v1267_v55, %v376_v56  ;;  %v1228_v56 = vld [vmem:[#allocation6 + $0x28] sm:$0xff] }
 0x47e   :  { %623 = vmatpush.bf16.msra.mxu1 %v1228_v56  ;;  %v711_v56 = vld [vmem:[#allocation7 + $0xa0] sm:$0xff] }
 0x47f   :  { %v378_v59 = vmul.f32 0.5, %v377_v58 }
 0x481   :  { %v379_v61 = vsub.f32 1.5, %v378_v59 }
 0x482   :  { %624 = vmatpush.bf16.msra.mxu1 %v1227_v57 }
 0x483   :  { %v380_v62 = vmul.f32 %v1267_v55, %v379_v61 }
 0x485   :  { %v384_v0 = vsel %vm383_vm11, %v1267_v55, %v380_v62 }
 0x486   :  { %v385_v2 = vmul.f32 %v384_v0, %v373_v63  ;;  %v1236_v0 = vld [vmem:[#allocation4 + $0x100] sm:$0xff] }
 0x487   :  { %697 = vmatpush.bf16.msrb.mxu3 %v1236_v0 }
 0x488   :  { %v386_v4 = vmul.f32 %v385_v2, %v359_v1  ;;  %v1235_v2 = vld [vmem:[#allocation4 + $0xf8] sm:$0xff] }
 0x48a   :  { %v387_v5 = vadd.f32 %v386_v4, %v360_v3  ;;  %v1234_v4 = vld [vmem:[#allocation4 + $0xf0] sm:$0xff] }
 0x48b   :  { %698 = vmatpush.bf16.msrb.mxu3 %v1235_v2 }
 0x48c   :  { %v392_v6 = vpack.c.bf16 %v387_v5, %v387_v5 }
 0x48e   :  { %1058 = vmatmul.msk.bf16.vlgmr.msrb.gmra.mxu1 %vm126_vm1, %v392_v6 }
 0x48f   :  { %699 = vmatpush.bf16.msrb.mxu3 %v1234_v4 }
 0x50b   :  { %v418_v10 = vpop.f32.mrf.mxu1 }
 0x50c   :  { %v419_v11 = vadd.f32 %v418_v10, %v393_v9 }
 0x50e   :  { %v422_v12 = vmax.f32 %v419_v11, 0.0  ;;  %v1231_v11 = vld [vmem:[#allocation4 + $0xd8] sm:$0xff] }
 0x510   :  { %v439_v13 = vpack.c.bf16 %v422_v12, %v422_v12 }
 0x512   :  { %497 = vmatmul.bf16.vlgmr.msrb.gmra.mxu2 %v439_v13 }
 0x513   :  { %v420_v14 = vpop.f32.mrf.mxu1 }
 0x595   :  { %v498_v16 = vpop.f32.mrf.mxu2 }
 0x596   :  { %v499_v17 = vadd.f32 %v498_v16, %v440_v15  ;;  %v567_v15 = vld [vmem:[#allocation7 + $0x80] sm:$0xff] }
 0x598   :  { %v502_v18 = vadd.f32 %v499_v17, %v387_v5  ;;  %v1233_v5 = vld [vmem:[#allocation4 + $0xe8] sm:$0xff] }
 0x599   :  { %700 = vmatpush.bf16.msrb.mxu3 %v1233_v5 }
 0x59a   :  { %v505_v19 = vsel %vm126_vm1, %v502_v18, 0.0  ;;  %v509_v20 = vmul.f32 %v502_v18, %v502_v18 }
 0x59b   :  { %506 = vadd.xlane.f32.xlu0 %v505_v19 }
 0x59c   :  { %v510_v21 = vsel %vm126_vm1, %v509_v20, 0.0 }
 0x59d   :  { %v500_v22 = vpop.f32.mrf.mxu2  ;;  %511 = vadd.xlane.f32.xlu1 %v510_v21  ;;  %701 = vmatpush.bf16.msrb.mxu3 %v1232_v8  ;;  %v1239_v8 = vld [vmem:[#allocation6 + $0x30] sm:$0xff] }
 0x59e   :  { %v1230_v22 = vld [vmem:[#allocation4 + $0xd0] sm:$0xff] }
 0x5a1   :  { %702 = vmatpush.bf16.msrb.mxu3 %v1231_v11 }
 0x5a5   :  { %703 = vmatpush.bf16.msrb.mxu3 %v1230_v22 }
 0x5a9   :  { %704 = vmatpush.bf16.msrb.mxu3 %v1229_v23  ;;  %v1244_v23 = vld [vmem:[#allocation4 + $0x120] sm:$0xff] }
 0x60e   :  { %v507_v25 = vpop.xlane.xlu0 %506 }
 0x60f   :  { %v508_v26 = vmul.f32 %v507_v25, %v1429_v27 }
 0x610   :  { %v512_v28 = vpop.xlane.xlu1 %511 }
 0x611   :  { %v514_v29 = vmul.f32 %v508_v26, %v508_v26  ;;  %v513_v30 = vmul.f32 %v512_v28, %v1429_v27  ;;  %v517_v40 = vsub.f32 %v502_v18, %v508_v26  ;;  %v568_v18 = vld [vmem:[#allocation7 + $0x88] sm:$0xff] }
 0x613   :  { %v515_v31 = vsub.f32 %v513_v30, %v514_v29 }
 0x615   :  { %v516_v32 = vmax.f32 %v515_v31, 0.0  ;;  %v648_v31 = vld [vmem:[#allocation7 + $0x98] sm:$0xff] }
 0x617   :  { %v518_v33 = vadd.f32 1e-05, %v516_v32 }
 0x619   :  { %1268 = vrsqrt.f32 %v518_v33  ;;  %vm525_vm13 = vweird.f32 %v518_v33 }
 0x61f   :  { %v1269_v34 = vpop.eup %1268 }
 0x620   :  { %v520_v35 = vmul.f32 %v1269_v34, %v518_v33  ;;  %vm526_vm12 = vweird.f32 %v1269_v34 }
 0x621   :  { %vm527_vm14 = vmor %vm525_vm13, %vm526_vm12 }
 0x622   :  { %v521_v36 = vmul.f32 %v1269_v34, %v520_v35 }
 0x624   :  { %v522_v37 = vmul.f32 0.5, %v521_v36 }
 0x626   :  { %v523_v38 = vsub.f32 1.5, %v522_v37 }
 0x628   :  { %v524_v39 = vmul.f32 %v1269_v34, %v523_v38 }
 0x62a   :  { %v528_v42 = vsel %vm527_vm14, %v1269_v34, %v524_v39  ;;  %v1238_v39 = vld [vmem:[#allocation4 + $0x40] sm:$0xff] }
 0x62b   :  { %v529_v43 = vmul.f32 %v528_v42, %v517_v40  ;;  %767 = vmatpush.bf16.msrb.mxu0 %v1238_v39  ;;  %v1237_v40 = vld [vmem:[#allocation4 + $0x38] sm:$0xff]  ;;  %v1241_v39 = vld [vmem:[#allocation4 + $0x108] sm:$0xff] }
 0x62d   :  { %v530_v45 = vmul.f32 %v529_v43, %v503_v41 }
 0x62f   :  { %v531_v46 = vadd.f32 %v530_v45, %v504_v44  ;;  %768 = vmatpush.bf16.msrb.mxu0 %v1237_v40  ;;  %v809_v40 = vld [vmem:[#allocation7 + $0xc8] sm:$0xff] }
 0x631   :  { %v536_v47 = vpack.c.bf16 %v531_v46, %v531_v46 }
 0x633   :  { %1099 = vmatmul.msk.bf16.vlgmr.msra.gmra.mxu0 %vm126_vm1, %v536_v47 }
 0x6b0   :  { %v562_v49 = vpop.f32.mrf.mxu0 }
 0x6b1   :  { %v563_v50 = vadd.f32 %v562_v49, %v537_v48 }
 0x6b3   :  { %v566_v51 = vadd.f32 %v563_v50, %v531_v46 }
 0x6b5   :  { %v569_v52 = vsel %vm126_vm1, %v566_v51, 0.0  ;;  %v573_v53 = vmul.f32 %v566_v51, %v566_v51 }
 0x6b6   :  { %570 = vadd.xlane.f32.xlu2 %v569_v52 }
 0x6b7   :  { %v574_v54 = vsel %vm126_vm1, %v573_v53, 0.0 }
 0x6b8   :  { %v564_v55 = vpop.f32.mrf.mxu0  ;;  %575 = vadd.xlane.f32.xlu0 %v574_v54 }
 0x729   :  { %v571_v58 = vpop.xlane.xlu2 %570 }
 0x72a   :  { %v572_v59 = vmul.f32 %v571_v58, %v1429_v27 }
 0x72b   :  { %v576_v60 = vpop.xlane.xlu0 %575 }
 0x72c   :  { %v578_v61 = vmul.f32 %v572_v59, %v572_v59  ;;  %v577_v62 = vmul.f32 %v576_v60, %v1429_v27  ;;  %v581_v14 = vsub.f32 %v566_v51, %v572_v59  ;;  %v712_v59 = vld [vmem:[#allocation7 + $0xa8] sm:$0xff] }
 0x72e   :  { %v579_v63 = vsub.f32 %v577_v62, %v578_v61 }
 0x730   :  { %v580_v1 = vmax.f32 %v579_v63, 0.0  ;;  %v745_v63 = vld [vmem:[#allocation7 + $0xb0] sm:$0xff] }
 0x732   :  { %v582_v3 = vadd.f32 1e-05, %v580_v1 }
 0x734   :  { %1270 = vrsqrt.f32 %v582_v3  ;;  %vm589_vm0 = vweird.f32 %v582_v3 }
 0x73a   :  { %v1271_v6 = vpop.eup %1270 }
 0x73b   :  { %v584_v7 = vmul.f32 %v1271_v6, %v582_v3  ;;  %vm590_vm15 = vweird.f32 %v1271_v6 }
 0x73c   :  { %vm591_vm2 = vmor %vm589_vm0, %vm590_vm15 }
 0x73d   :  { %v585_v9 = vmul.f32 %v1271_v6, %v584_v7  ;;  %v1240_v7 = vld [vmem:[#allocation6 + $0x38] sm:$0xff] }
 0x73e   :  { %831 = vmatpush.bf16.msrb.mxu1 %v1240_v7 }
 0x73f   :  { %v586_v10 = vmul.f32 0.5, %v585_v9 }
 0x741   :  { %v587_v12 = vsub.f32 1.5, %v586_v10 }
 0x742   :  { %832 = vmatpush.bf16.msrb.mxu1 %v1239_v8 }
 0x743   :  { %v588_v13 = vmul.f32 %v1271_v6, %v587_v12 }
 0x745   :  { %v592_v16 = vsel %vm591_vm2, %v1271_v6, %v588_v13 }
 0x746   :  { %v593_v17 = vmul.f32 %v592_v16, %v581_v14 }
 0x748   :  { %v594_v19 = vmul.f32 %v593_v17, %v567_v15  ;;  %v1248_v15 = vld [vmem:[#allocation4 + $0x140] sm:$0xff]  ;;  %v1247_v17 = vld [vmem:[#allocation4 + $0x138] sm:$0xff] }
 0x749   :  { %905 = vmatpush.bf16.msra.mxu2 %v1248_v15 }
 0x74a   :  { %v595_v20 = vadd.f32 %v594_v19, %v568_v18  ;;  %v1246_v19 = vld [vmem:[#allocation4 + $0x130] sm:$0xff] }
 0x74c   :  { %v600_v21 = vpack.c.bf16 %v595_v20, %v595_v20 }
 0x74d   :  { %906 = vmatpush.bf16.msra.mxu2 %v1247_v17 }
 0x74e   :  { %1108 = vmatmul.msk.bf16.vlgmr.msra.gmra.mxu1 %vm126_vm1, %v600_v21 }
 0x751   :  { %907 = vmatpush.bf16.msra.mxu2 %v1246_v19 }
 0x7cb   :  { %v626_v25 = vpop.f32.mrf.mxu1 }
 0x7cc   :  { %v627_v26 = vadd.f32 %v626_v25, %v601_v24 }
 0x7ce   :  { %v630_v28 = vmax.f32 %v627_v26, 0.0  ;;  %v1243_v26 = vld [vmem:[#allocation4 + $0x118] sm:$0xff] }
 0x7d0   :  { %v647_v29 = vpack.c.bf16 %v630_v28, %v630_v28 }
 0x7d2   :  { %705 = vmatmul.bf16.vlgmr.msrb.gmra.mxu3 %v647_v29 }
 0x7d3   :  { %v628_v30 = vpop.f32.mrf.mxu1 }
 0x855   :  { %v706_v32 = vpop.f32.mrf.mxu3 }
 0x856   :  { %v707_v33 = vadd.f32 %v706_v32, %v648_v31  ;;  %v775_v31 = vld [vmem:[#allocation7 + $0xb8] sm:$0xff] }
 0x858   :  { %v710_v34 = vadd.f32 %v707_v33, %v595_v20  ;;  %v1245_v20 = vld [vmem:[#allocation4 + $0x128] sm:$0xff] }
 0x859   :  { %908 = vmatpush.bf16.msra.mxu2 %v1245_v20 }
 0x85a   :  { %v713_v35 = vsel %vm126_vm1, %v710_v34, 0.0  ;;  %v717_v36 = vmul.f32 %v710_v34, %v710_v34 }
 0x85b   :  { %714 = vadd.xlane.f32.xlu1 %v713_v35 }
 0x85c   :  { %v718_v37 = vsel %vm126_vm1, %v717_v36, 0.0 }
 0x85d   :  { %v708_v38 = vpop.f32.mrf.mxu3  ;;  %719 = vadd.xlane.f32.xlu2 %v718_v37  ;;  %909 = vmatpush.bf16.msra.mxu2 %v1244_v23 }
 0x85e   :  { %v1242_v38 = vld [vmem:[#allocation4 + $0x110] sm:$0xff] }
 0x861   :  { %910 = vmatpush.bf16.msra.mxu2 %v1243_v26 }
 0x865   :  { %911 = vmatpush.bf16.msra.mxu2 %v1242_v38 }
 0x869   :  { %912 = vmatpush.bf16.msra.mxu2 %v1241_v39 }
 0x8ce   :  { %v715_v41 = vpop.xlane.xlu1 %714 }
 0x8cf   :  { %v716_v42 = vmul.f32 %v715_v41, %v1429_v27 }
 0x8d0   :  { %v720_v43 = vpop.xlane.xlu2 %719 }
 0x8d1   :  { %v722_v44 = vmul.f32 %v716_v42, %v716_v42  ;;  %v721_v45 = vmul.f32 %v720_v43, %v1429_v27  ;;  %v725_v55 = vsub.f32 %v710_v34, %v716_v42  ;;  %v776_v34 = vld [vmem:[#allocation7 + $0xc0] sm:$0xff] }
 0x8d3   :  { %v723_v46 = vsub.f32 %v721_v45, %v722_v44 }
 0x8d5   :  { %v724_v47 = vmax.f32 %v723_v46, 0.0  ;;  %v856_v46 = vld [vmem:[#allocation7 + $0xd0] sm:$0xff] }
 0x8d7   :  { %v726_v48 = vadd.f32 1e-05, %v724_v47 }
 0x8d9   :  { %1272 = vrsqrt.f32 %v726_v48  ;;  %vm733_vm4 = vweird.f32 %v726_v48 }
 0x8df   :  { %v1273_v49 = vpop.eup %1272 }
 0x8e0   :  { %v728_v50 = vmul.f32 %v1273_v49, %v726_v48  ;;  %vm734_vm3 = vweird.f32 %v1273_v49 }
 0x8e1   :  { %vm735_vm5 = vmor %vm733_vm4, %vm734_vm3 }
 0x8e2   :  { %v729_v51 = vmul.f32 %v1273_v49, %v728_v50 }
 0x8e4   :  { %v730_v52 = vmul.f32 0.5, %v729_v51 }
 0x8e6   :  { %v731_v53 = vsub.f32 1.5, %v730_v52 }
 0x8e8   :  { %v732_v54 = vmul.f32 %v1273_v49, %v731_v53 }
 0x8ea   :  { %v736_v57 = vsel %vm735_vm5, %v1273_v49, %v732_v54  ;;  %v1250_v54 = vld [vmem:[#allocation6 + $0x48] sm:$0xff] }
 0x8eb   :  { %v737_v58 = vmul.f32 %v736_v57, %v725_v55  ;;  %971 = vmatpush.bf16.msra.mxu0 %v1250_v54  ;;  %v1249_v55 = vld [vmem:[#allocation6 + $0x40] sm:$0xff] }
 0x8ed   :  { %v738_v60 = vmul.f32 %v737_v58, %v711_v56 }
 0x8ef   :  { %v739_v61 = vadd.f32 %v738_v60, %v712_v59  ;;  %972 = vmatpush.bf16.msra.mxu0 %v1249_v55 }
 0x8f1   :  { %v744_v62 = vpack.c.bf16 %v739_v61, %v739_v61 }
 0x8f3   :  { %1149 = vmatmul.msk.bf16.vlgmr.msrb.gmra.mxu0 %vm126_vm1, %v744_v62 }
 0x970   :  { %v770_v0 = vpop.f32.mrf.mxu0 }
 0x971   :  { %v771_v1 = vadd.f32 %v770_v0, %v745_v63 }
 0x973   :  { %v774_v2 = vadd.f32 %v771_v1, %v739_v61 }
 0x975   :  { %v777_v3 = vsel %vm126_vm1, %v774_v2, 0.0  ;;  %v781_v4 = vmul.f32 %v774_v2, %v774_v2 }
 0x976   :  { %778 = vadd.xlane.f32.xlu0 %v777_v3 }
 0x977   :  { %v782_v5 = vsel %vm126_vm1, %v781_v4, 0.0 }
 0x978   :  { %v772_v6 = vpop.f32.mrf.mxu0  ;;  %783 = vadd.xlane.f32.xlu1 %v782_v5 }
 0x9e9   :  { %v779_v9 = vpop.xlane.xlu0 %778 }
 0x9ea   :  { %v780_v10 = vmul.f32 %v779_v9, %v1429_v27 }
 0x9eb   :  { %v784_v11 = vpop.xlane.xlu1 %783 }
 0x9ec   :  { %v786_v12 = vmul.f32 %v780_v10, %v780_v10  ;;  %v785_v13 = vmul.f32 %v784_v11, %v1429_v27  ;;  %v789_v30 = vsub.f32 %v774_v2, %v780_v10 }
 0x9ee   :  { %v787_v14 = vsub.f32 %v785_v13, %v786_v12 }
 0x9f0   :  { %v788_v16 = vmax.f32 %v787_v14, 0.0 }
 0x9f2   :  { %v790_v18 = vadd.f32 1e-05, %v788_v16 }
 0x9f4   :  { %1274 = vrsqrt.f32 %v790_v18  ;;  %vm797_vm7 = vweird.f32 %v790_v18 }
 0x9fa   :  { %v1275_v21 = vpop.eup %1274 }
 0x9fb   :  { %v792_v22 = vmul.f32 %v1275_v21, %v790_v18  ;;  %vm798_vm6 = vweird.f32 %v1275_v21 }
 0x9fc   :  { %vm799_vm8 = vmor %vm797_vm7, %vm798_vm6 }
 0x9fd   :  { %v793_v24 = vmul.f32 %v1275_v21, %v792_v22 }
 0x9ff   :  { %v794_v25 = vmul.f32 0.5, %v793_v24 }
 0xa01   :  { %v795_v28 = vsub.f32 1.5, %v794_v25 }
 0xa03   :  { %v796_v29 = vmul.f32 %v1275_v21, %v795_v28 }
 0xa05   :  { %v800_v32 = vsel %vm799_vm8, %v1275_v21, %v796_v29 }
 0xa06   :  { %v801_v33 = vmul.f32 %v800_v32, %v789_v30 }
 0xa08   :  { %v802_v35 = vmul.f32 %v801_v33, %v775_v31 }
 0xa0a   :  { %v803_v36 = vadd.f32 %v802_v35, %v776_v34 }
 0xa0c   :  { %v808_v37 = vpack.c.bf16 %v803_v36, %v803_v36 }
 0xa0e   :  { %1158 = vmatmul.msk.bf16.vlgmr.msrb.gmra.mxu1 %vm126_vm1, %v808_v37 }
 0xa8b   :  { %v834_v41 = vpop.f32.mrf.mxu1 }
 0xa8c   :  { %v835_v42 = vadd.f32 %v834_v41, %v809_v40 }
 0xa8e   :  { %v838_v43 = vmax.f32 %v835_v42, 0.0 }
 0xa90   :  { %v855_v44 = vpack.c.bf16 %v838_v43, %v838_v43 }
 0xa92   :  { %913 = vmatmul.bf16.vlgmr.msra.gmra.mxu2 %v855_v44 }
 0xa93   :  { %v836_v45 = vpop.f32.mrf.mxu1 }
 0xb15   :  { %v914_v47 = vpop.f32.mrf.mxu2 }
 0xb16   :  { %v915_v48 = vadd.f32 %v914_v47, %v856_v46 }
 0xb18   :  { %v918_v49 = vadd.f32 %v915_v48, %v803_v36 }
 0xb1a   :  { %v919_v50 = vsel %vm126_vm1, %v918_v49, 0.0  ;;  %v923_v51 = vmul.f32 %v918_v49, %v918_v49 }
 0xb1b   :  { %920 = vadd.xlane.f32.xlu2 %v919_v50 }
 0xb1c   :  { %v924_v52 = vsel %vm126_vm1, %v923_v51, 0.0 }
 0xb1d   :  { %v916_v53 = vpop.f32.mrf.mxu2  ;;  %925 = vadd.xlane.f32.xlu0 %v924_v52 }
 0xb8e   :  { %v921_v56 = vpop.xlane.xlu2 %920 }
 0xb8f   :  { %v922_v57 = vmul.f32 %v921_v56, %v1429_v27 }
 0xb90   :  { %v926_v58 = vpop.xlane.xlu0 %925 }
 0xb91   :  { %v928_v59 = vmul.f32 %v922_v57, %v922_v57  ;;  %v927_v60 = vmul.f32 %v926_v58, %v1429_v27  ;;  %v931_v6 = vsub.f32 %v918_v49, %v922_v57  ;;  %v949_v27 = vld [vmem:[#allocation7 + $0xd8] sm:$0xff] }
 0xb93   :  { %v929_v61 = vsub.f32 %v927_v60, %v928_v59 }
 0xb95   :  { %v930_v62 = vmax.f32 %v929_v61, 0.0 }
 0xb97   :  { %v932_v63 = vadd.f32 1e-05, %v930_v62 }
 0xb99   :  { %1276 = vrsqrt.f32 %v932_v63  ;;  %vm939_vm10 = vweird.f32 %v932_v63 }
 0xb9f   :  { %v1277_v0 = vpop.eup %1276 }
 0xba0   :  { %v934_v1 = vmul.f32 %v1277_v0, %v932_v63  ;;  %vm940_vm9 = vweird.f32 %v1277_v0 }
 0xba1   :  { %vm941_vm11 = vmor %vm939_vm10, %vm940_vm9 }
 0xba2   :  { %v935_v2 = vmul.f32 %v1277_v0, %v934_v1 }
 0xba4   :  { %v936_v3 = vmul.f32 0.5, %v935_v2 }
 0xba6   :  { %v937_v4 = vsub.f32 1.5, %v936_v3 }
 0xba8   :  { %v938_v5 = vmul.f32 %v1277_v0, %v937_v4 }
 0xbaa   :  { %v942_v7 = vsel %vm941_vm11, %v1277_v0, %v938_v5 }
 0xbab   :  { %v943_v8 = vmul.f32 %v942_v7, %v931_v6 }
 0xbad   :  { %v948_v9 = vpack.c.bf16 %v943_v8, %v943_v8 }
 0xbaf   :  { %1199 = vmatmul.msk.bf16.vlgmr.msra.gmra.mxu0 %vm126_vm1, %v948_v9 }
 0xc2c   :  { %v974_v10 = vpop.f32.mrf.mxu0 }
 0xc2d   :  { %v975_v11 = vadd.f32 %v974_v10, %v949_v27 }
 0xc2f   :  { %978 = vst [vmem:[%s1476_s4] sm:$0xff] %v975_v11 }
 0xc34   :  { %v976_v12 = vpop.f32.mrf.mxu0 }
 0xc35   :  { %983 = vsyncpa [#allocation3], 1 }
 0xc36   :  { %984 = vsyncpa [#allocation5], 1 }
 0xc37   :  { %985 = vsyncpa [#allocation8], 1 }

</bundles_post_ra>
